<compile_context>
chip_gen: v6e
topology: v6e:2x2x1
jax: 0.10.0
libtpu: 0.0.40
codegen_flags: <defaults>
</compile_context>

<pallas_src>
import jax
import jax.numpy as jnp
from jax import lax
from jax.experimental import pallas as pl
from jax.experimental.pallas import tpu as pltpu


def _cosine_kernel(e1_ref, e2_ref,
                   w1_ref, b1_ref, w2_ref, b2_ref, w3_ref, b3_ref,
                   out_ref):
    """One batch tile: fused dual projection + cosine distance.

    e1_ref/e2_ref: (T, D) f32 tiles; w*_ref: bf16 weights; b*_ref: f32 biases.
    out_ref: (T, 1) f32 distances.
    """
    eps_sq = jnp.float32(1e-12)          # eps = 1e-6 (clamp squared norms)
    t = e1_ref.shape[0]

    # Stack both inputs on the batch (sublane) axis -> one matmul chain,
    # each weight matrix pushed to the MXU once per tile.
    x = jnp.concatenate([e1_ref[...], e2_ref[...]], axis=0)          # (2T, D) f32

    # bf16 MXU matmuls, f32 accumulation; bias/ReLU in f32.
    h = jnp.dot(x.astype(jnp.bfloat16), w1_ref[...],
                preferred_element_type=jnp.float32) + b1_ref[...]
    h = jnp.maximum(h, 0.0)
    h = jnp.dot(h.astype(jnp.bfloat16), w2_ref[...],
                preferred_element_type=jnp.float32) + b2_ref[...]
    h = jnp.maximum(h, 0.0)
    p = jnp.dot(h.astype(jnp.bfloat16), w3_ref[...],
                preferred_element_type=jnp.float32) + b3_ref[...]    # (2T, 8) f32

    p1 = p[:t, :]
    p2 = p[t:, :]

    # Cosine distance over the feature axis (torch dim=1), per-norm eps clamp:
    #   1 - <p1,p2> / (max(||p1||,eps) * max(||p2||,eps))
    # expressed with EUP rsqrt on clamped squared norms (sqrt is monotonic, so
    # rsqrt(max(||p||^2, eps^2)) == 1 / max(||p||, eps)).
    dot = jnp.sum(p1 * p2, axis=-1, keepdims=True)                   # (T, 1)
    n1s = jnp.sum(p1 * p1, axis=-1, keepdims=True)
    n2s = jnp.sum(p2 * p2, axis=-1, keepdims=True)
    inv = lax.rsqrt(jnp.maximum(n1s, eps_sq)) * lax.rsqrt(jnp.maximum(n2s, eps_sq))
    out_ref[...] = 1.0 - dot * inv


def _round_up(x, m):
    return (x + m - 1) // m * m


def cosine_model(e1, e2, params, *, tile_b=1024):
    """Calls the Pallas kernel; returns a (B,) cosine-distance vector."""
    w1, b1, w2, b2, w3, b3 = params
    B, D = e1.shape

    # Cast weights to bf16 once (MXU-native dtype); biases stay f32.
    w1b, w2b, w3b = (w.astype(jnp.bfloat16) for w in (w1, w2, w3))

    # Batch tile: large for pipelining, but never larger than the padded batch.
    tb = min(tile_b, _round_up(B, 8))
    b_pad = _round_up(B, tb)
    if b_pad != B:
        pad = b_pad - B
        e1 = jnp.pad(e1, ((0, pad), (0, 0)))
        e2 = jnp.pad(e2, ((0, pad), (0, 0)))

    grid = (b_pad // tb,)

    act_spec = pl.BlockSpec((tb, D), lambda i: (i, 0))
    const_map = lambda i: (0, 0)     # weights/biases: VMEM-resident across tiles
    weight_specs = [
        pl.BlockSpec(w1b.shape, const_map), pl.BlockSpec(b1.shape, const_map),
        pl.BlockSpec(w2b.shape, const_map), pl.BlockSpec(b2.shape, const_map),
        pl.BlockSpec(w3b.shape, const_map), pl.BlockSpec(b3.shape, const_map),
    ]

    flops = 2 * (2 * b_pad) * (D * 64 + 64 * 32 + 32 * 8)
    param_bytes = sum(int(a.size) * a.dtype.itemsize
                      for a in (w1b, b1, w2b, b2, w3b, b3))
    cost = pl.CostEstimate(flops=flops,
                           transcendentals=2 * b_pad,
                           bytes_accessed=(2 * b_pad * D + b_pad) * 4 + param_bytes)

    out = pl.pallas_call(
        _cosine_kernel,
        out_shape=jax.ShapeDtypeStruct((b_pad, 1), jnp.float32),
        grid_spec=pltpu.PrefetchScalarGridSpec(
            num_scalar_prefetch=0,
            grid=grid,
            in_specs=[act_spec, act_spec] + weight_specs,
            out_specs=pl.BlockSpec((tb, 1), lambda i: (i, 0)),
        ),
        compiler_params=pltpu.CompilerParams(
            dimension_semantics=("parallel",),
            vmem_limit_bytes=32 * 1024 * 1024,
        ),
        cost_estimate=cost,
    )(e1, e2, w1b, b1, w2b, b2, w3b, b3)

    return out[:B, 0]


def init_params(key, input_dim):
    """Deterministic PyTorch-style (uniform +-1/sqrt(fan_in)) init, f32."""
    dims = [(input_dim, 64), (64, 32), (32, 8)]
    params = []
    for fan_in, fan_out in dims:
        key, kw, kb = jax.random.split(key, 3)
        bound = 1.0 / (fan_in ** 0.5)
        w = jax.random.uniform(kw, (fan_in, fan_out), jnp.float32, -bound, bound)
        b = jax.random.uniform(kb, (1, fan_out), jnp.float32, -bound, bound)
        params += [w, b]
    return tuple(params)


def _project_ref(x, w1, b1, w2, b2, w3, b3, *, bf16_matmul):
    def mm(a, w):
        if bf16_matmul:
            return jnp.dot(a.astype(jnp.bfloat16), w.astype(jnp.bfloat16),
                           preferred_element_type=jnp.float32)
        return jnp.dot(a, w, preferred_element_type=jnp.float32)
    h = jnp.maximum(mm(x, w1) + b1, 0.0)
    h = jnp.maximum(mm(h, w2) + b2, 0.0)
    return mm(h, w3) + b3


def _reference(e1, e2, params, *, bf16_matmul):
    """Pure-JAX reference of the PyTorch forward pass."""
    w1, b1, w2, b2, w3, b3 = params
    p1 = _project_ref(e1, w1, b1, w2, b2, w3, b3, bf16_matmul=bf16_matmul)
    p2 = _project_ref(e2, w1, b1, w2, b2, w3, b3, bf16_matmul=bf16_matmul)
    eps = 1e-6
    n1 = jnp.maximum(jnp.linalg.norm(p1, axis=1), eps)
    n2 = jnp.maximum(jnp.linalg.norm(p2, axis=1), eps)
    return 1.0 - jnp.sum(p1 * p2, axis=1) / (n1 * n2)


if __name__ == "__main__":
    key = jax.random.PRNGKey(0)
    input_dim = 32
    batch = 8

    kp, k1, k2 = jax.random.split(key, 3)
    params = init_params(kp, input_dim)
    e1 = jax.random.normal(k1, (batch, input_dim), jnp.float32)
    e2 = jax.random.normal(k2, (batch, input_dim), jnp.float32)

    out = jax.block_until_ready(cosine_model(e1, e2, params))
    assert out.shape == (batch,), out.shape

    # Kernel correctness: compare against a precision-matched reference
    # (same bf16-matmul / f32-accumulate arithmetic) with a tight tolerance.
    ref_bf16 = _reference(e1, e2, params, bf16_matmul=True)
    assert jnp.allclose(out, ref_bf16, atol=2e-3, rtol=2e-3), (out, ref_bf16)

    # Semantics sanity check against the exact f32 (PyTorch) forward pass;
    # bf16 MXU inputs give ~1e-2-level agreement on this distance metric.
    ref_f32 = _reference(e1, e2, params, bf16_matmul=False)
    assert jnp.allclose(out, ref_f32, atol=5e-2, rtol=5e-2), (out, ref_f32)

    print("KERNEL_OK")
</pallas_src>

<mosaic_0001>
module attributes {stable_mosaic.version = 11 : i64} {
  func.func @_cosine_kernel(%arg0: i32, %arg1: memref<8x32xf32, #tpu.memory_space<vmem>>, %arg2: memref<8x32xf32, #tpu.memory_space<vmem>>, %arg3: memref<32x64xbf16, #tpu.memory_space<vmem>>, %arg4: memref<1x64xf32, #tpu.memory_space<vmem>>, %arg5: memref<64x32xbf16, #tpu.memory_space<vmem>>, %arg6: memref<1x32xf32, #tpu.memory_space<vmem>>, %arg7: memref<32x8xbf16, #tpu.memory_space<vmem>>, %arg8: memref<1x8xf32, #tpu.memory_space<vmem>>, %arg9: memref<8x1xf32, #tpu.memory_space<vmem>>) attributes {dimension_semantics = [#tpu.dimension_semantics<parallel>], iteration_bounds = array<i64: 1>, scalar_prefetch = 0 : i64, scratch_operands = 0 : i64, tpu.core_type = #tpu.core_type<tc>, window_params = [{transform_indices = @transform_0, window_bounds = array<i64: 8, 32>}, {transform_indices = @transform_1, window_bounds = array<i64: 8, 32>}, {pipeline_mode = #tpu.pipeline_mode<synchronous>, transform_indices = @transform_2, window_bounds = array<i64: 32, 64>}, {pipeline_mode = #tpu.pipeline_mode<synchronous>, transform_indices = @transform_3, window_bounds = array<i64: 1, 64>}, {pipeline_mode = #tpu.pipeline_mode<synchronous>, transform_indices = @transform_4, window_bounds = array<i64: 64, 32>}, {pipeline_mode = #tpu.pipeline_mode<synchronous>, transform_indices = @transform_5, window_bounds = array<i64: 1, 32>}, {pipeline_mode = #tpu.pipeline_mode<synchronous>, transform_indices = @transform_6, window_bounds = array<i64: 32, 8>}, {pipeline_mode = #tpu.pipeline_mode<synchronous>, transform_indices = @transform_7, window_bounds = array<i64: 1, 8>}, {transform_indices = @transform_8, window_bounds = array<i64: 8, 1>}]} {
    %c0 = arith.constant 0 : index
    %c0_0 = arith.constant 0 : index
    %0 = vector.load %arg1[%c0, %c0_0] : memref<8x32xf32, #tpu.memory_space<vmem>>, vector<8x32xf32>
    %c0_1 = arith.constant 0 : index
    %c0_2 = arith.constant 0 : index
    %1 = vector.load %arg2[%c0_1, %c0_2] : memref<8x32xf32, #tpu.memory_space<vmem>>, vector<8x32xf32>
    %2 = tpu.concatenate %0, %1 in 0 : vector<8x32xf32>, vector<8x32xf32> -> vector<16x32xf32>
    %3 = arith.truncf %2 : vector<16x32xf32> to vector<16x32xbf16>
    %c0_3 = arith.constant 0 : index
    %c0_4 = arith.constant 0 : index
    %4 = vector.load %arg3[%c0_3, %c0_4] : memref<32x64xbf16, #tpu.memory_space<vmem>>, vector<32x64xbf16>
    %cst = arith.constant dense<0.000000e+00> : vector<16x64xf32>
    %5 = tpu.matmul %3, %4, %cst {dimension_numbers = #tpu.dot_dimension_numbers<[1], [0], [0], [1], [0, 0, 1, 1], [], []>} : vector<16x32xbf16>, vector<32x64xbf16>, vector<16x64xf32> -> vector<16x64xf32>
    %c0_5 = arith.constant 0 : index
    %c0_6 = arith.constant 0 : index
    %6 = vector.load %arg4[%c0_5, %c0_6] : memref<1x64xf32, #tpu.memory_space<vmem>>, vector<1x64xf32>
    %7 = vector.broadcast %6 : vector<1x64xf32> to vector<16x64xf32>
    %8 = arith.addf %5, %7 : vector<16x64xf32>
    %cst_7 = arith.constant 0.000000e+00 : f32
    %9 = vector.broadcast %cst_7 : f32 to vector<16x64xf32>
    %10 = arith.maximumf %8, %9 : vector<16x64xf32>
    %11 = arith.truncf %10 : vector<16x64xf32> to vector<16x64xbf16>
    %c0_8 = arith.constant 0 : index
    %c0_9 = arith.constant 0 : index
    %12 = vector.load %arg5[%c0_8, %c0_9] : memref<64x32xbf16, #tpu.memory_space<vmem>>, vector<64x32xbf16>
    %cst_10 = arith.constant dense<0.000000e+00> : vector<16x32xf32>
    %13 = tpu.matmul %11, %12, %cst_10 {dimension_numbers = #tpu.dot_dimension_numbers<[1], [0], [0], [1], [0, 0, 1, 1], [], []>} : vector<16x64xbf16>, vector<64x32xbf16>, vector<16x32xf32> -> vector<16x32xf32>
    %c0_11 = arith.constant 0 : index
    %c0_12 = arith.constant 0 : index
    %14 = vector.load %arg6[%c0_11, %c0_12] : memref<1x32xf32, #tpu.memory_space<vmem>>, vector<1x32xf32>
    %15 = vector.broadcast %14 : vector<1x32xf32> to vector<16x32xf32>
    %16 = arith.addf %13, %15 : vector<16x32xf32>
    %cst_13 = arith.constant 0.000000e+00 : f32
    %17 = vector.broadcast %cst_13 : f32 to vector<16x32xf32>
    %18 = arith.maximumf %16, %17 : vector<16x32xf32>
    %19 = arith.truncf %18 : vector<16x32xf32> to vector<16x32xbf16>
    %c0_14 = arith.constant 0 : index
    %c0_15 = arith.constant 0 : index
    %20 = vector.load %arg7[%c0_14, %c0_15] : memref<32x8xbf16, #tpu.memory_space<vmem>>, vector<32x8xbf16>
    %cst_16 = arith.constant dense<0.000000e+00> : vector<16x8xf32>
    %21 = tpu.matmul %19, %20, %cst_16 {dimension_numbers = #tpu.dot_dimension_numbers<[1], [0], [0], [1], [0, 0, 1, 1], [], []>} : vector<16x32xbf16>, vector<32x8xbf16>, vector<16x8xf32> -> vector<16x8xf32>
    %c0_17 = arith.constant 0 : index
    %c0_18 = arith.constant 0 : index
    %22 = vector.load %arg8[%c0_17, %c0_18] : memref<1x8xf32, #tpu.memory_space<vmem>>, vector<1x8xf32>
    %23 = vector.broadcast %22 : vector<1x8xf32> to vector<16x8xf32>
    %24 = arith.addf %21, %23 : vector<16x8xf32>
    %25 = vector.extract_strided_slice %24 {offsets = [0, 0], sizes = [8, 8], strides = [1, 1]} : vector<16x8xf32> to vector<8x8xf32>
    %26 = vector.extract_strided_slice %24 {offsets = [8, 0], sizes = [8, 8], strides = [1, 1]} : vector<16x8xf32> to vector<8x8xf32>
    %27 = arith.mulf %25, %26 : vector<8x8xf32>
    %cst_19 = arith.constant dense<0.000000e+00> : vector<8xf32>
    %28 = vector.multi_reduction <add>, %27, %cst_19 [1] : vector<8x8xf32> to vector<8xf32>
    %29 = vector.shape_cast %28 : vector<8xf32> to vector<8x1xf32>
    %30 = arith.mulf %25, %25 : vector<8x8xf32>
    %cst_20 = arith.constant dense<0.000000e+00> : vector<8xf32>
    %31 = vector.multi_reduction <add>, %30, %cst_20 [1] : vector<8x8xf32> to vector<8xf32>
    %32 = vector.shape_cast %31 : vector<8xf32> to vector<8x1xf32>
    %33 = arith.mulf %26, %26 : vector<8x8xf32>
    %cst_21 = arith.constant dense<0.000000e+00> : vector<8xf32>
    %34 = vector.multi_reduction <add>, %33, %cst_21 [1] : vector<8x8xf32> to vector<8xf32>
    %35 = vector.shape_cast %34 : vector<8xf32> to vector<8x1xf32>
    %cst_22 = arith.constant 9.99999996E-13 : f32
    %36 = vector.broadcast %cst_22 : f32 to vector<8x1xf32>
    %37 = arith.maximumf %32, %36 : vector<8x1xf32>
    %38 = math.rsqrt %37 : vector<8x1xf32>
    %cst_23 = arith.constant 9.99999996E-13 : f32
    %39 = vector.broadcast %cst_23 : f32 to vector<8x1xf32>
    %40 = arith.maximumf %35, %39 : vector<8x1xf32>
    %41 = math.rsqrt %40 : vector<8x1xf32>
    %42 = arith.mulf %38, %41 : vector<8x1xf32>
    %43 = arith.mulf %29, %42 : vector<8x1xf32>
    %cst_24 = arith.constant 1.000000e+00 : f32
    %44 = vector.broadcast %cst_24 : f32 to vector<8x1xf32>
    %45 = arith.subf %44, %43 : vector<8x1xf32>
    %c0_25 = arith.constant 0 : index
    %c0_26 = arith.constant 0 : index
    %46 = vector.load %arg9[%c0_25, %c0_26] : memref<8x1xf32, #tpu.memory_space<vmem>>, vector<8x1xf32>
    tpu.vector_store %arg9[%c0_25, %c0_26], %45 {strides = array<i32>} : memref<8x1xf32, #tpu.memory_space<vmem>>, vector<8x1xf32>,
    return
  }
  func.func @transform_0(%arg0: i32) -> (i32, i32) {
    %c0_i32 = arith.constant 0 : i32
    %c0_i32_0 = arith.constant 0 : i32
    return %arg0, %c0_i32 : i32, i32
  }
  func.func @transform_1(%arg0: i32) -> (i32, i32) {
    %c0_i32 = arith.constant 0 : i32
    %c0_i32_0 = arith.constant 0 : i32
    return %arg0, %c0_i32 : i32, i32
  }
  func.func @transform_2(%arg0: i32) -> (i32, i32) {
    %c0_i32 = arith.constant 0 : i32
    %c0_i32_0 = arith.constant 0 : i32
    %c0_i32_1 = arith.constant 0 : i32
    return %c0_i32, %c0_i32_0 : i32, i32
  }
  func.func @transform_3(%arg0: i32) -> (i32, i32) {
    %c0_i32 = arith.constant 0 : i32
    %c0_i32_0 = arith.constant 0 : i32
    %c0_i32_1 = arith.constant 0 : i32
    return %c0_i32, %c0_i32_0 : i32, i32
  }
  func.func @transform_4(%arg0: i32) -> (i32, i32) {
    %c0_i32 = arith.constant 0 : i32
    %c0_i32_0 = arith.constant 0 : i32
    %c0_i32_1 = arith.constant 0 : i32
    return %c0_i32, %c0_i32_0 : i32, i32
  }
  func.func @transform_5(%arg0: i32) -> (i32, i32) {
    %c0_i32 = arith.constant 0 : i32
    %c0_i32_0 = arith.constant 0 : i32
    %c0_i32_1 = arith.constant 0 : i32
    return %c0_i32, %c0_i32_0 : i32, i32
  }
  func.func @transform_6(%arg0: i32) -> (i32, i32) {
    %c0_i32 = arith.constant 0 : i32
    %c0_i32_0 = arith.constant 0 : i32
    %c0_i32_1 = arith.constant 0 : i32
    return %c0_i32, %c0_i32_0 : i32, i32
  }
  func.func @transform_7(%arg0: i32) -> (i32, i32) {
    %c0_i32 = arith.constant 0 : i32
    %c0_i32_0 = arith.constant 0 : i32
    %c0_i32_1 = arith.constant 0 : i32
    return %c0_i32, %c0_i32_0 : i32, i32
  }
  func.func @transform_8(%arg0: i32) -> (i32, i32) {
    %c0_i32 = arith.constant 0 : i32
    %c0_i32_0 = arith.constant 0 : i32
    return %arg0, %c0_i32 : i32, i32
  }
}

</mosaic_0001>

<bundles_post_ra>
// kernel: tpu_custom_call.1
= control target key start
LH: loop header
LB: loop body
LE: loop exit
PB: predicated region body
PF: predicated region fallthrough
CT: control target
= control target key end

     0   :  { %v351_v0 = vmov 0.0   ;;  %vm352_vm0 = vmmov 0   ;;  %vm56_vm1 = vcmask 261120   ;;  %vm143_vm2 = vcmask 523264   ;;  %s445_s2 = inlined_call_operand.vmem [shape: bf16[32,64], index: 2, kind: input, shape index: {}]   ;;  %s446_s0 = inlined_call_operand.vmem [shape: f32[8,32], index: 0, kind: input, shape index: {}]   ;;  %s447_s1 = inlined_call_operand.vmem [shape: f32[8,32], index: 1, kind: input, shape index: {}]   ;;  %s448_s4 = inlined_call_operand.vmem [shape: bf16[64,32], index: 4, kind: input, shape index: {}]   ;;  %s449_s3 = inlined_call_operand.vmem [shape: f32[1,64], index: 3, kind: input, shape index: {}]   ;;  %s450_s6 = inlined_call_operand.vmem [shape: bf16[32,8], index: 6, kind: input, shape index: {}]   ;;  %s451_s5 = inlined_call_operand.vmem [shape: f32[1,32], index: 5, kind: input, shape index: {}]   ;;  %s452_s7 = inlined_call_operand.vmem [shape: f32[1,8], index: 7, kind: input, shape index: {}]   ;;  %s453_s8 = inlined_call_operand.vmem [shape: f32[8,1], index: 8, kind: output, shape index: {}]  }
   0x1   :  { %309 = vmatprep.subr.bf16.mxu0 %v351_v0  ;;  %v339_v1 = vld [vmem:[%s445_s2 + $0x8] sm:$0xff]   ;;  %313 = vmatprep.mubr.msk.bf16.mxu0 %vm352_vm0, %v351_v0  ;;  %v340_v2 = vld [vmem:[%s445_s2] sm:$0xff]   ;;  %v341_v5 = vld [vmem:[%s448_s4 + $0x18] sm:$0xff]   ;;  %vm259_vm3 = vcmask 64512   ;;  %vm278_vm4 = vcmask 7168  }
   0x2   :  { %317 = vmatprep.subr.bf16.mxu1 %v351_v0  ;;  %325 = vmatprep.mubr.msk.bf16.mxu1 %vm352_vm0, %v351_v0  ;;  %v30_v3 = vld [vmem:[%s446_s0] sm:$0xff]  ;;  %v342_v7 = vld [vmem:[%s448_s4 + $0x10] sm:$0xff]   ;;  %v343_v8 = vld [vmem:[%s448_s4 + $0x8] sm:$0xff]  }
   0x3   :  { %310 = vmatpush3.bf16.msra.mxu0 %v339_v1  ;;  %v31_v4 = vld [vmem:[%s447_s1] sm:$0xff]  ;;  %318 = vmatpush3.bf16.msra.mxu1 %v341_v5  ;;  %v345_v20 = vld [vmem:[%s450_s6 + $0x8] sm:$0xff]  }
   0x4   :  { %311 = vmatprep.subr.bf16.mxu0 %v351_v0  ;;  %v32_v6 = vpack.c.bf16 %v31_v4, %v30_v3  ;;  %319 = vmatprep.subr.bf16.mxu1 %v351_v0  ;;  %v344_v9 = vld [vmem:[%s448_s4] sm:$0xff]  }
   0x5   :  { %v284_v10 = vld [vmem:[%s449_s3] ss:$0 sm:$0xff] }
   0x6   :  { %v346_v21 = vld [vmem:[%s450_s6] sm:$0xff]  }
   0x7   :  { %312 = vmatpush3.bf16.msra.mxu0 %v340_v2  ;;  %320 = vmatpush3.bf16.msra.mxu1 %v342_v7  ;;  %v288_v22 = vld [vmem:[%s451_s5] ss:$0 sm:$0xff] }
   0x8   :  { %329 = vmatprep.subr.bf16.mxu0 %v351_v0  ;;  %321 = vmatprep.subr.bf16.mxu1 %v351_v0  ;;  %v294_v32 = vld [vmem:[%s452_s7] ss:$0 sm:$0xff] }
   0xa   :  { %314 = vmatmul.mubr.msk.bf16.vlgmr.msra.gmra.mxu0 %vm56_vm1, %v32_v6 }
   0xb   :  { %333 = vmatprep.mubr.msk.bf16.mxu0 %vm352_vm0, %v351_v0  ;;  %322 = vmatpush3.bf16.msra.mxu1 %v343_v8 }
   0xc   :  { %323 = vmatprep.subr.bf16.mxu1 %v351_v0  ;;  %330 = vmatpush3.bf16.msra.mxu0 %v345_v20 }
   0xd   :  { %331 = vmatprep.subr.bf16.mxu0 %v351_v0 }
   0xf   :  { %324 = vmatpush3.bf16.msra.mxu1 %v344_v9 }
  0x10   :  { %332 = vmatpush3.bf16.msra.mxu0 %v346_v21 }
  0xca   :  { %v94_v11 = vpop.f32.mrf.mxu0 }
  0xcb   :  { %v95_v13 = vadd.f32 %v284_v10, %v94_v11 }
  0xcc   :  { %v315_v12 = vpop.f32.mrf.mxu0 }
  0xcd   :  { %v101_v17 = vmax.f32 %v95_v13, 0.0 }
  0xce   :  { %v97_v14 = vpop.f32.mrf.mxu0 }
  0xcf   :  { %v98_v15 = vadd.f32 %v284_v10, %v97_v14 }
  0xd0   :  { %v316_v16 = vpop.f32.mrf.mxu0 }
  0xd1   :  { %v102_v18 = vmax.f32 %v98_v15, 0.0 }
  0xd3   :  { %v103_v19 = vpack.c.bf16 %v102_v18, %v101_v17 }
  0xd5   :  { %326 = vmatmul.mubr.msk.bf16.vlgmr.msra.gmra.mxu1 %vm143_vm2, %v103_v19 }
 0x195   :  { %v181_v23 = vpop.f32.mrf.mxu1 }
 0x196   :  { %v182_v25 = vadd.f32 %v288_v22, %v181_v23 }
 0x197   :  { %v327_v24 = vpop.f32.mrf.mxu1 }
 0x198   :  { %v188_v29 = vmax.f32 %v182_v25, 0.0 }
 0x199   :  { %v184_v26 = vpop.f32.mrf.mxu1 }
 0x19a   :  { %v185_v27 = vadd.f32 %v288_v22, %v184_v26 }
 0x19b   :  { %v328_v28 = vpop.f32.mrf.mxu1 }
 0x19c   :  { %v189_v30 = vmax.f32 %v185_v27, 0.0 }
 0x19e   :  { %v190_v31 = vpack.c.bf16 %v189_v30, %v188_v29 }
 0x1a0   :  { %334 = vmatmul.mubr.msk.bf16.vlgmr.msra.gmra.mxu0 %vm56_vm1, %v190_v31 }
 0x260   :  { %v251_v33 = vpop.f32.mrf.mxu0 }
 0x261   :  { %v252_v34 = vadd.f32 %v294_v32, %v251_v33 }
 0x262   :  { %v335_v35 = vpop.f32.mrf.mxu0 }
 0x263   :  { %v263_v36 = vmul.f32 %v252_v34, %v252_v34 }
 0x264   :  { %v254_v37 = vpop.f32.mrf.mxu0 }
 0x265   :  { %v255_v38 = vadd.f32 %v294_v32, %v254_v37  ;;  %v264_v39 = vsel %vm259_vm3, %v263_v36, 0.0 }
 0x266   :  { %265 = vadd.xlane.f32.xlu0 %v264_v39  ;;  %v336_v40 = vpop.f32.mrf.mxu0 }
 0x267   :  { %v267_v41 = vmul.f32 %v255_v38, %v255_v38  ;;  %v258_v42 = vmul.f32 %v255_v38, %v252_v34 }
 0x269   :  { %v268_v43 = vsel %vm259_vm3, %v267_v41, 0.0  ;;  %v260_v44 = vsel %vm259_vm3, %v258_v42, 0.0 }
 0x26a   :  { %269 = vadd.xlane.f32.xlu0 %v268_v43  ;;  %261 = vadd.xlane.f32.xlu1 %v260_v44 }
 0x2ef   :  { %v266_v45 = vpop.xlane.xlu0 %265 }
 0x2f0   :  { %v271_v46 = vmax.f32 %v266_v45, 1e-12 }
 0x2f2   :  { %347 = vrsqrt.f32 %v271_v46 }
 0x2f3   :  { %v270_v47 = vpop.xlane.xlu0 %269  ;;  %v262_v52 = vpop.xlane.xlu1 %261 }
 0x2f4   :  { %v273_v48 = vmax.f32 %v270_v47, 1e-12 }
 0x2f6   :  { %349 = vrsqrt.f32 %v273_v48 }
 0x2ff   :  { %v348_v49 = vpop.eup %347 }
 0x303   :  { %v350_v50 = vpop.eup %349 }
 0x304   :  { %v275_v51 = vmul.f32 %v350_v50, %v348_v49 }
 0x306   :  { %v276_v53 = vmul.f32 %v275_v51, %v262_v52 }
 0x308   :  { %v277_v54 = vsub.f32 1.0, %v276_v53 }
 0x30a   :  { %279 = vst.msk [vmem:[%s453_s8] sm:$0xff] %vm278_vm4, %v277_v54 }

</bundles_post_ra>
